<compile_context>
chip_gen: v5e
topology: v5e:2x2
jax: 0.10.0
libtpu: 0.0.40
codegen_flags: <defaults>
</compile_context>

<pallas_src>
import functools
import math

import jax
import jax.numpy as jnp
from jax.experimental import pallas as pl
from jax.experimental.pallas import tpu as pltpu


# ---------------------------------------------------------------------------
# Kernels
# ---------------------------------------------------------------------------
def _rmsnorm_qkv_kernel(x_ref, g_ref, wq_ref, wk_ref, wv_ref,
                        q_ref, k_ref, v_ref, *, eps):
    """RMSNorm(x) followed by the three attention input projections."""
    x = x_ref[...].astype(jnp.float32)                       # (tn, dim)
    ms = jnp.mean(x * x, axis=-1, keepdims=True)
    xn = x * jax.lax.rsqrt(ms + eps) * g_ref[...]             # (1, dim) broadcasts
    q_ref[...] = jnp.dot(xn, wq_ref[...],
                         preferred_element_type=jnp.float32).astype(q_ref.dtype)
    k_ref[...] = jnp.dot(xn, wk_ref[...],
                         preferred_element_type=jnp.float32).astype(k_ref.dtype)
    v_ref[...] = jnp.dot(xn, wv_ref[...],
                         preferred_element_type=jnp.float32).astype(v_ref.dtype)


def _attn_kernel(q_ref, k_ref, v_ref, m_ref, o_ref, *, scale):
    """Single (batch, head) attention: softmax((q k^T)*scale + mask) @ v."""
    q = q_ref[...][0, 0].astype(jnp.float32)                  # (S, hd)
    k = k_ref[...][0, 0].astype(jnp.float32)                  # (S, hd)
    v = v_ref[...][0, 0].astype(jnp.float32)                  # (S, hd)
    s = jnp.dot(q, k.T, preferred_element_type=jnp.float32) * scale + m_ref[...]
    s = s - jnp.max(s, axis=-1, keepdims=True)
    p = jnp.exp(s)
    p = p / jnp.sum(p, axis=-1, keepdims=True)
    out = jnp.dot(p, v, preferred_element_type=jnp.float32)
    o_ref[...] = out[None, None].astype(o_ref.dtype)


def _wo_residual_kernel(a_ref, w_ref, x_ref, o_ref):
    """attn_out @ wo + residual."""
    o_ref[...] = (jnp.dot(a_ref[...].astype(jnp.float32), w_ref[...],
                          preferred_element_type=jnp.float32)
                  + x_ref[...].astype(jnp.float32)).astype(o_ref.dtype)


def _ffn_kernel(h_ref, g_ref, w1_ref, w3_ref, w2_ref, o_ref, *, eps):
    """Fused: RMSNorm(h) -> silu(h@w1) * (h@w3) -> @w2 -> + h."""
    h = h_ref[...].astype(jnp.float32)                        # (tn, dim)
    ms = jnp.mean(h * h, axis=-1, keepdims=True)
    hn = h * jax.lax.rsqrt(ms + eps) * g_ref[...]
    a = jnp.dot(hn, w1_ref[...], preferred_element_type=jnp.float32)
    b = jnp.dot(hn, w3_ref[...], preferred_element_type=jnp.float32)
    gate = a * (1.0 / (1.0 + jnp.exp(-a)))                    # SiLU
    o_ref[...] = (jnp.dot(gate * b, w2_ref[...],
                          preferred_element_type=jnp.float32) + h).astype(o_ref.dtype)


# ---------------------------------------------------------------------------
# pallas_call wrappers
# ---------------------------------------------------------------------------
def _row_tile(n: int) -> int:
    """Largest row tile that divides n; multiples of 8 preferred."""
    if n % 8 == 0:
        for t in (512, 256, 128, 64, 32, 16, 8):
            if n % t == 0:
                return t
    return n


def _rmsnorm_qkv(x2d, g_row, wq, wk, wv, eps):
    n, dim = x2d.shape
    dq, dkv = wq.shape[1], wk.shape[1]
    tn = _row_tile(n)
    grid = (n // tn,)
    kern = functools.partial(_rmsnorm_qkv_kernel, eps=eps)
    return pl.pallas_call(
        kern,
        out_shape=(jax.ShapeDtypeStruct((n, dq), x2d.dtype),
                   jax.ShapeDtypeStruct((n, dkv), x2d.dtype),
                   jax.ShapeDtypeStruct((n, dkv), x2d.dtype)),
        grid_spec=pltpu.PrefetchScalarGridSpec(
            num_scalar_prefetch=0,
            grid=grid,
            in_specs=[pl.BlockSpec((tn, dim), lambda i: (i, 0)),
                      pl.BlockSpec((1, dim), lambda i: (0, 0)),
                      pl.BlockSpec((dim, dq), lambda i: (0, 0)),
                      pl.BlockSpec((dim, dkv), lambda i: (0, 0)),
                      pl.BlockSpec((dim, dkv), lambda i: (0, 0))],
            out_specs=(pl.BlockSpec((tn, dq), lambda i: (i, 0)),
                       pl.BlockSpec((tn, dkv), lambda i: (i, 0)),
                       pl.BlockSpec((tn, dkv), lambda i: (i, 0)))),
        compiler_params=pltpu.CompilerParams(dimension_semantics=("parallel",)),
    )(x2d, g_row, wq, wk, wv)


def _attention_core(q, k, v, mask, n_rep, scale):
    b, h, s, hd = q.shape
    kern = functools.partial(_attn_kernel, scale=scale)
    return pl.pallas_call(
        kern,
        out_shape=jax.ShapeDtypeStruct((b, h, s, hd), q.dtype),
        grid_spec=pltpu.PrefetchScalarGridSpec(
            num_scalar_prefetch=0,
            grid=(b, h),
            in_specs=[
                pl.BlockSpec((1, 1, s, hd), lambda bi, hi: (bi, hi, 0, 0)),
                # GQA: head hi reads kv-head hi // n_rep (repeat_interleave).
                pl.BlockSpec((1, 1, s, hd), lambda bi, hi: (bi, hi // n_rep, 0, 0)),
                pl.BlockSpec((1, 1, s, hd), lambda bi, hi: (bi, hi // n_rep, 0, 0)),
                pl.BlockSpec((s, s), lambda bi, hi: (0, 0)),
            ],
            out_specs=pl.BlockSpec((1, 1, s, hd), lambda bi, hi: (bi, hi, 0, 0))),
        compiler_params=pltpu.CompilerParams(
            dimension_semantics=("parallel", "parallel")),
    )(q, k, v, mask)


def _wo_residual(a2d, wo, x2d):
    n, dq = a2d.shape
    dim = wo.shape[1]
    tn = _row_tile(n)
    grid = (n // tn,)
    return pl.pallas_call(
        _wo_residual_kernel,
        out_shape=jax.ShapeDtypeStruct((n, dim), x2d.dtype),
        grid_spec=pltpu.PrefetchScalarGridSpec(
            num_scalar_prefetch=0,
            grid=grid,
            in_specs=[pl.BlockSpec((tn, dq), lambda i: (i, 0)),
                      pl.BlockSpec((dq, dim), lambda i: (0, 0)),
                      pl.BlockSpec((tn, dim), lambda i: (i, 0))],
            out_specs=pl.BlockSpec((tn, dim), lambda i: (i, 0))),
        compiler_params=pltpu.CompilerParams(dimension_semantics=("parallel",)),
    )(a2d, wo, x2d)


def _ffn(h2d, g_row, w1, w3, w2, eps):
    n, dim = h2d.shape
    hidden = w1.shape[1]
    tn = _row_tile(n)
    grid = (n // tn,)
    kern = functools.partial(_ffn_kernel, eps=eps)
    return pl.pallas_call(
        kern,
        out_shape=jax.ShapeDtypeStruct((n, dim), h2d.dtype),
        grid_spec=pltpu.PrefetchScalarGridSpec(
            num_scalar_prefetch=0,
            grid=grid,
            in_specs=[pl.BlockSpec((tn, dim), lambda i: (i, 0)),
                      pl.BlockSpec((1, dim), lambda i: (0, 0)),
                      pl.BlockSpec((dim, hidden), lambda i: (0, 0)),
                      pl.BlockSpec((dim, hidden), lambda i: (0, 0)),
                      pl.BlockSpec((hidden, dim), lambda i: (0, 0))],
            out_specs=pl.BlockSpec((tn, dim), lambda i: (i, 0))),
        compiler_params=pltpu.CompilerParams(dimension_semantics=("parallel",)),
    )(h2d, g_row, w1, w3, w2)


def transformer_block(x, start_pos, mask, params, *, n_heads, n_kv_heads,
                      eps=1e-6):
    """Pallas equivalent of TransformerBlock.forward(x, start_pos, mask)."""
    del start_pos  # unused, as in the PyTorch module (no KV cache here)
    bsz, seqlen, dim = x.shape
    head_dim = dim // n_heads
    n_rep = n_heads // n_kv_heads
    n = bsz * seqlen

    x2d = x.reshape(n, dim)

    # 1) attention_norm + q/k/v projections (fused)
    q2d, k2d, v2d = _rmsnorm_qkv(
        x2d, params["attn_norm"][None, :],
        params["wq"], params["wk"], params["wv"], eps)

    # layout plumbing (done by XLA in the wrapper)
    q = q2d.reshape(bsz, seqlen, n_heads, head_dim).transpose(0, 2, 1, 3)
    k = k2d.reshape(bsz, seqlen, n_kv_heads, head_dim).transpose(0, 2, 1, 3)
    v = v2d.reshape(bsz, seqlen, n_kv_heads, head_dim).transpose(0, 2, 1, 3)

    # 2) attention core per (batch, head), GQA sharing via index_map
    attn = _attention_core(q, k, v, mask, n_rep, 1.0 / math.sqrt(head_dim))
    attn2d = attn.transpose(0, 2, 1, 3).reshape(n, n_heads * head_dim)

    # 3) output projection + residual (fused)
    h2d = _wo_residual(attn2d, params["wo"], x2d)

    # 4) ffn_norm + SwiGLU FFN + residual (fully fused)
    out2d = _ffn(h2d, params["ffn_norm"][None, :],
                 params["w1"], params["w3"], params["w2"], eps)
    return out2d.reshape(bsz, seqlen, dim)


# ---------------------------------------------------------------------------
# Pure-JAX reference mirroring the PyTorch module
# ---------------------------------------------------------------------------
def _reference_block(x, mask, params, *, n_heads, n_kv_heads, eps=1e-6):
    bsz, seqlen, dim = x.shape
    head_dim = dim // n_heads
    n_rep = n_heads // n_kv_heads

    def rmsnorm(t, w):
        ms = jnp.mean(t.astype(jnp.float32) ** 2, axis=-1, keepdims=True)
        return (t.astype(jnp.float32) * jax.lax.rsqrt(ms + eps)).astype(t.dtype) * w

    xn = rmsnorm(x, params["attn_norm"])
    xq = xn @ params["wq"]
    xk = xn @ params["wk"]
    xv = xn @ params["wv"]
    xq = xq.reshape(bsz, seqlen, n_heads, head_dim)
    xk = xk.reshape(bsz, seqlen, n_kv_heads, head_dim)
    xv = xv.reshape(bsz, seqlen, n_kv_heads, head_dim)
    keys = jnp.repeat(xk, n_rep, axis=2)       # repeat_interleave semantics
    values = jnp.repeat(xv, n_rep, axis=2)
    xq = xq.transpose(0, 2, 1, 3)
    keys = keys.transpose(0, 2, 1, 3)
    values = values.transpose(0, 2, 1, 3)
    scores = (xq @ keys.transpose(0, 1, 3, 2)) / math.sqrt(head_dim)
    scores = scores + mask
    scores = jax.nn.softmax(scores.astype(jnp.float32), axis=-1).astype(xq.dtype)
    out = scores @ values
    out = out.transpose(0, 2, 1, 3).reshape(bsz, seqlen, -1)
    h = x + out @ params["wo"]

    hn = rmsnorm(h, params["ffn_norm"])
    a = hn @ params["w1"]
    b = hn @ params["w3"]
    ff = (a * jax.nn.sigmoid(a) * b) @ params["w2"]
    return h + ff


def _ffn_hidden_dim(dim, multiple_of, ffn_dim_multiplier=None):
    hidden = 4 * dim
    hidden = int(2 * hidden / 3)
    if ffn_dim_multiplier is not None:
        hidden = int(ffn_dim_multiplier * hidden)
    return multiple_of * ((hidden + multiple_of - 1) // multiple_of)


# ---------------------------------------------------------------------------
if __name__ == "__main__":
    key = jax.random.PRNGKey(0)

    B, S, DIM = 2, 8, 32
    N_HEADS, N_KV_HEADS = 4, 2
    MULTIPLE_OF = 32
    HEAD_DIM = DIM // N_HEADS
    HIDDEN = _ffn_hidden_dim(DIM, MULTIPLE_OF)          # 96
    EPS = 1e-6

    ks = jax.random.split(key, 8)
    scale = 0.05
    params = {
        "attn_norm": jnp.ones((DIM,), jnp.float32),
        "ffn_norm": jnp.ones((DIM,), jnp.float32),
        "wq": scale * jax.random.normal(ks[1], (DIM, N_HEADS * HEAD_DIM), jnp.float32),
        "wk": scale * jax.random.normal(ks[2], (DIM, N_KV_HEADS * HEAD_DIM), jnp.float32),
        "wv": scale * jax.random.normal(ks[3], (DIM, N_KV_HEADS * HEAD_DIM), jnp.float32),
        "wo": scale * jax.random.normal(ks[4], (N_HEADS * HEAD_DIM, DIM), jnp.float32),
        "w1": scale * jax.random.normal(ks[5], (DIM, HIDDEN), jnp.float32),
        "w3": scale * jax.random.normal(ks[6], (DIM, HIDDEN), jnp.float32),
        "w2": scale * jax.random.normal(ks[7], (HIDDEN, DIM), jnp.float32),
    }

    x = jax.random.normal(ks[0], (B, S, DIM), jnp.float32)
    # causal additive mask (same array used by kernel and reference)
    row = jnp.arange(S)[:, None]
    col = jnp.arange(S)[None, :]
    mask = jnp.where(col <= row, 0.0, -1e9).astype(jnp.float32)

    out = transformer_block(x, 0, mask, params,
                            n_heads=N_HEADS, n_kv_heads=N_KV_HEADS, eps=EPS)
    out = jax.block_until_ready(out)

    ref = _reference_block(x, mask, params,
                           n_heads=N_HEADS, n_kv_heads=N_KV_HEADS, eps=EPS)

    assert out.shape == (B, S, DIM), out.shape
    assert out.dtype == jnp.float32, out.dtype
    assert jnp.allclose(out, ref, atol=1e-4, rtol=1e-4), (
        "mismatch vs reference, max err = %e"
        % float(jnp.max(jnp.abs(out - ref))))

    print("KERNEL_OK")
</pallas_src>

<mosaic_0001>
module attributes {stable_mosaic.version = 11 : i64} {
  func.func @_rmsnorm_qkv_kernel(%arg0: i32, %arg1: memref<16x32xf32, #tpu.memory_space<vmem>>, %arg2: memref<1x32xf32, #tpu.memory_space<vmem>>, %arg3: memref<32x32xf32, #tpu.memory_space<vmem>>, %arg4: memref<32x16xf32, #tpu.memory_space<vmem>>, %arg5: memref<32x16xf32, #tpu.memory_space<vmem>>, %arg6: memref<16x32xf32, #tpu.memory_space<vmem>>, %arg7: memref<16x16xf32, #tpu.memory_space<vmem>>, %arg8: memref<16x16xf32, #tpu.memory_space<vmem>>) attributes {dimension_semantics = [#tpu.dimension_semantics<parallel>], iteration_bounds = array<i64: 1>, scalar_prefetch = 0 : i64, scratch_operands = 0 : i64, tpu.core_type = #tpu.core_type<tc>, window_params = [{transform_indices = @transform_0, window_bounds = array<i64: 16, 32>}, {pipeline_mode = #tpu.pipeline_mode<synchronous>, transform_indices = @transform_1, window_bounds = array<i64: 1, 32>}, {pipeline_mode = #tpu.pipeline_mode<synchronous>, transform_indices = @transform_2, window_bounds = array<i64: 32, 32>}, {pipeline_mode = #tpu.pipeline_mode<synchronous>, transform_indices = @transform_3, window_bounds = array<i64: 32, 16>}, {pipeline_mode = #tpu.pipeline_mode<synchronous>, transform_indices = @transform_4, window_bounds = array<i64: 32, 16>}, {transform_indices = @transform_5, window_bounds = array<i64: 16, 32>}, {transform_indices = @transform_6, window_bounds = array<i64: 16, 16>}, {transform_indices = @transform_7, window_bounds = array<i64: 16, 16>}]} {
    %c0 = arith.constant 0 : index
    %c0_0 = arith.constant 0 : index
    %0 = vector.load %arg1[%c0, %c0_0] : memref<16x32xf32, #tpu.memory_space<vmem>>, vector<16x32xf32>
    %1 = arith.mulf %0, %0 : vector<16x32xf32>
    %cst = arith.constant dense<0.000000e+00> : vector<16xf32>
    %2 = vector.multi_reduction <add>, %1, %cst [1] : vector<16x32xf32> to vector<16xf32>
    %3 = vector.shape_cast %2 : vector<16xf32> to vector<16x1xf32>
    %cst_1 = arith.constant 3.200000e+01 : f32
    %4 = vector.broadcast %cst_1 : f32 to vector<16x1xf32>
    %5 = arith.divf %3, %4 : vector<16x1xf32>
    %cst_2 = arith.constant 9.99999997E-7 : f32
    %6 = vector.broadcast %cst_2 : f32 to vector<16x1xf32>
    %7 = arith.addf %5, %6 : vector<16x1xf32>
    %8 = math.rsqrt %7 : vector<16x1xf32>
    %9 = vector.broadcast %8 : vector<16x1xf32> to vector<16x32xf32>
    %10 = arith.mulf %0, %9 : vector<16x32xf32>
    %c0_3 = arith.constant 0 : index
    %c0_4 = arith.constant 0 : index
    %11 = vector.load %arg2[%c0_3, %c0_4] : memref<1x32xf32, #tpu.memory_space<vmem>>, vector<1x32xf32>
    %12 = vector.broadcast %11 : vector<1x32xf32> to vector<16x32xf32>
    %13 = arith.mulf %10, %12 : vector<16x32xf32>
    %c0_5 = arith.constant 0 : index
    %c0_6 = arith.constant 0 : index
    %14 = vector.load %arg3[%c0_5, %c0_6] : memref<32x32xf32, #tpu.memory_space<vmem>>, vector<32x32xf32>
    %cst_7 = arith.constant dense<0.000000e+00> : vector<16x32xf32>
    %15 = tpu.matmul %13, %14, %cst_7 {dimension_numbers = #tpu.dot_dimension_numbers<[1], [0], [0], [1], [0, 0, 1, 1], [], []>} : vector<16x32xf32>, vector<32x32xf32>, vector<16x32xf32> -> vector<16x32xf32>
    %c0_8 = arith.constant 0 : index
    %c0_9 = arith.constant 0 : index
    %16 = vector.load %arg6[%c0_8, %c0_9] : memref<16x32xf32, #tpu.memory_space<vmem>>, vector<16x32xf32>
    tpu.vector_store %arg6[%c0_8, %c0_9], %15 {strides = array<i32>} : memref<16x32xf32, #tpu.memory_space<vmem>>, vector<16x32xf32>,
    %c0_10 = arith.constant 0 : index
    %c0_11 = arith.constant 0 : index
    %17 = vector.load %arg4[%c0_10, %c0_11] : memref<32x16xf32, #tpu.memory_space<vmem>>, vector<32x16xf32>
    %cst_12 = arith.constant dense<0.000000e+00> : vector<16x16xf32>
    %18 = tpu.matmul %13, %17, %cst_12 {dimension_numbers = #tpu.dot_dimension_numbers<[1], [0], [0], [1], [0, 0, 1, 1], [], []>} : vector<16x32xf32>, vector<32x16xf32>, vector<16x16xf32> -> vector<16x16xf32>
    %c0_13 = arith.constant 0 : index
    %c0_14 = arith.constant 0 : index
    %19 = vector.load %arg7[%c0_13, %c0_14] : memref<16x16xf32, #tpu.memory_space<vmem>>, vector<16x16xf32>
    tpu.vector_store %arg7[%c0_13, %c0_14], %18 {strides = array<i32>} : memref<16x16xf32, #tpu.memory_space<vmem>>, vector<16x16xf32>,
    %c0_15 = arith.constant 0 : index
    %c0_16 = arith.constant 0 : index
    %20 = vector.load %arg5[%c0_15, %c0_16] : memref<32x16xf32, #tpu.memory_space<vmem>>, vector<32x16xf32>
    %cst_17 = arith.constant dense<0.000000e+00> : vector<16x16xf32>
    %21 = tpu.matmul %13, %20, %cst_17 {dimension_numbers = #tpu.dot_dimension_numbers<[1], [0], [0], [1], [0, 0, 1, 1], [], []>} : vector<16x32xf32>, vector<32x16xf32>, vector<16x16xf32> -> vector<16x16xf32>
    %c0_18 = arith.constant 0 : index
    %c0_19 = arith.constant 0 : index
    %22 = vector.load %arg8[%c0_18, %c0_19] : memref<16x16xf32, #tpu.memory_space<vmem>>, vector<16x16xf32>
    tpu.vector_store %arg8[%c0_18, %c0_19], %21 {strides = array<i32>} : memref<16x16xf32, #tpu.memory_space<vmem>>, vector<16x16xf32>,
    return
  }
  func.func @transform_0(%arg0: i32) -> (i32, i32) {
    %c0_i32 = arith.constant 0 : i32
    %c0_i32_0 = arith.constant 0 : i32
    return %arg0, %c0_i32 : i32, i32
  }
  func.func @transform_1(%arg0: i32) -> (i32, i32) {
    %c0_i32 = arith.constant 0 : i32
    %c0_i32_0 = arith.constant 0 : i32
    %c0_i32_1 = arith.constant 0 : i32
    return %c0_i32, %c0_i32_0 : i32, i32
  }
  func.func @transform_2(%arg0: i32) -> (i32, i32) {
    %c0_i32 = arith.constant 0 : i32
    %c0_i32_0 = arith.constant 0 : i32
    %c0_i32_1 = arith.constant 0 : i32
    return %c0_i32, %c0_i32_0 : i32, i32
  }
  func.func @transform_3(%arg0: i32) -> (i32, i32) {
    %c0_i32 = arith.constant 0 : i32
    %c0_i32_0 = arith.constant 0 : i32
    %c0_i32_1 = arith.constant 0 : i32
    return %c0_i32, %c0_i32_0 : i32, i32
  }
  func.func @transform_4(%arg0: i32) -> (i32, i32) {
    %c0_i32 = arith.constant 0 : i32
    %c0_i32_0 = arith.constant 0 : i32
    %c0_i32_1 = arith.constant 0 : i32
    return %c0_i32, %c0_i32_0 : i32, i32
  }
  func.func @transform_5(%arg0: i32) -> (i32, i32) {
    %c0_i32 = arith.constant 0 : i32
    %c0_i32_0 = arith.constant 0 : i32
    return %arg0, %c0_i32 : i32, i32
  }
  func.func @transform_6(%arg0: i32) -> (i32, i32) {
    %c0_i32 = arith.constant 0 : i32
    %c0_i32_0 = arith.constant 0 : i32
    return %arg0, %c0_i32 : i32, i32
  }
  func.func @transform_7(%arg0: i32) -> (i32, i32) {
    %c0_i32 = arith.constant 0 : i32
    %c0_i32_0 = arith.constant 0 : i32
    return %arg0, %c0_i32 : i32, i32
  }
}

</mosaic_0001>

<bundles_post_ra>
// kernel: tpu_custom_call.1
= control target key start
LH: loop header
LB: loop body
LE: loop exit
PB: predicated region body
PF: predicated region fallthrough
CT: control target
= control target key end

     0   :  { %13 = vsyncpa [#allocation3], 0  ;;  %vm29_vm0 = vcmask 261120   ;;  %s445_s0 = inlined_call_operand.vmem [shape: f32[16,32], index: 0, kind: input, shape index: {}]   ;;  %s446_s1 = inlined_call_operand.vmem [shape: f32[1,32], index: 1, kind: input, shape index: {}]   ;;  %s447_s2 = inlined_call_operand.vmem [shape: f32[32,32], index: 2, kind: input, shape index: {}]   ;;  %s448_s3 = inlined_call_operand.vmem [shape: f32[32,16], index: 3, kind: input, shape index: {}]   ;;  %s449_s4 = inlined_call_operand.vmem [shape: f32[32,16], index: 4, kind: input, shape index: {}]   ;;  %s450_s5 = inlined_call_operand.hbm [shape: f32[16,32], index: 5, kind: output, shape index: {0}]   ;;  %s451_s6 = inlined_call_operand.hbm [shape: f32[16,16], index: 6, kind: output, shape index: {1}]   ;;  %s452_s7 = inlined_call_operand.hbm [shape: f32[16,16], index: 7, kind: output, shape index: {2}]  }
   0x1   :  { %v370_v0 = vld [vmem:[%s445_s0] sm:$0xff] }
   0x2   :  { %v27_v1 = vmul.f32 %v370_v0, %v370_v0 }
   0x3   :  { %14 = vsyncpa [#allocation5], 0  ;;  %v377_v2 = vld [vmem:[%s445_s0 + $0x8] sm:$0xff]  ;;  %v321_v6 = vmov 32.0   ;;  %v78_v10 = vld [vmem:[%s447_s2 + $0x18] sm:$0xff]  ;;  %vm137_vm8 = vcmask 130048  }
   0x4   :  { %v30_v3 = vsel %vm29_vm0, %v27_v1, 0.0  ;;  %v28_v4 = vmul.f32 %v377_v2, %v377_v2  ;;  %239 = vrcp.f32 %v321_v6  ;;  %v113_v11 = vld [vmem:[%s448_s3 + $0x18] sm:$0xff]  ;;  %97 = vmatpush.msra.mxu0 %v78_v10  ;;  %v77_v13 = vld [vmem:[%s447_s2 + $0x10] sm:$0xff]  ;;  %228 = vmatpush.msra.mxu3 %v78_v10  ;;  %v76_v17 = vld [vmem:[%s447_s2 + $0x8] sm:$0xff]  ;;  %s188_s0 = sshll.u32 %s451_s6, 4  ;;  %s323_s30 = smov [#allocation2]   ;;  %s189_s0 = int_to_ptr.hbm [resolvable:$true] %s188_s0 }
   0x5   :  { %31 = vadd.xlane.f32.xlu0 %v30_v3  ;;  %v143_v12 = vld [vmem:[%s449_s4 + $0x18] sm:$0xff]  ;;  %126 = vmatpush.msra.mxu1 %v113_v11  ;;  %v112_v14 = vld [vmem:[%s448_s3 + $0x10] sm:$0xff]  ;;  %v111_v18 = vld [vmem:[%s448_s3 + $0x8] sm:$0xff]  ;;  %s173_s8 = sshll.u32 %s323_s30, 4  ;;  %s175_s11 = sshll.u32 %s450_s5, 4  ;;  %s174_s8 = int_to_ptr.vmem [resolvable:$true] %s173_s8  ;;  %s176_s11 = int_to_ptr.hbm [resolvable:$true] %s175_s11 }
   0x6   :  { %v33_v5 = vsel %vm29_vm0, %v28_v4, 0.0  ;;  %156 = vmatpush.msra.mxu2 %v143_v12  ;;  %v142_v15 = vld [vmem:[%s449_s4 + $0x10] sm:$0xff]  ;;  %98 = vmatpush.msra.mxu0 %v77_v13  ;;  %v141_v19 = vld [vmem:[%s449_s4 + $0x8] sm:$0xff]  ;;  %v75_v20 = vld [vmem:[%s447_s2] sm:$0xff]  ;;  %s324_s12 = smov 128   ;;  %s325_s13 = smov 8  }
   0x7   :  { %127 = vmatpush.msra.mxu1 %v112_v14  ;;  %229 = vmatpush.msra.mxu3 %v77_v13  ;;  %v110_v21 = vld [vmem:[%s448_s3] sm:$0xff]  ;;  %s326_s14 = smov [#allocation6]   ;;  %s201_s17 = sshll.u32 %s452_s7, 4  ;;  %s202_s17 = int_to_ptr.hbm [resolvable:$true] %s201_s17 }
   0x8   :  { %157 = vmatpush.msra.mxu2 %v142_v15  ;;  %99 = vmatpush.msra.mxu0 %v76_v17  ;;  %v140_v22 = vld [vmem:[%s449_s4] sm:$0xff]  ;;  %s199_s15 = sshll.u32 %s326_s14, 4  ;;  %s200_s15 = int_to_ptr.vmem [resolvable:$true] %s199_s15 }
   0x9   :  { %128 = vmatpush.msra.mxu1 %v111_v18  ;;  %230 = vmatpush.msra.mxu3 %v76_v17  ;;  %v238_v39 = vld [vmem:[%s446_s1] ss:$0 sm:$0xff]  ;;  %s322_s1 = smov [#allocation4]  }
   0xa   :  { %v240_v7 = vpop.eup %239  ;;  %158 = vmatpush.msra.mxu2 %v141_v19  ;;  %100 = vmatpush.msra.mxu0 %v75_v20  ;;  %s186_s4 = sshll.u32 %s322_s1, 4  ;;  %s187_s4 = int_to_ptr.vmem [resolvable:$true] %s186_s4 }
   0xb   :  { %v37_v8 = vmul.f32 32.0, %v240_v7  ;;  %129 = vmatpush.msra.mxu1 %v110_v21  ;;  %vm41_vm1 = vweird.f32 %v240_v7  ;;  %231 = vmatpush.msra.mxu3 %v75_v20 }
   0xc   :  { %159 = vmatpush.msra.mxu2 %v140_v22 }
   0xd   :  { %34 = vadd.xlane.f32.xlu0 %v33_v5  ;;  %v38_v9 = vsub.f32 1.0, %v37_v8 }
   0xf   :  { %v39_v16 = vmul.f32 %v240_v7, %v38_v9 }
  0x11   :  { %v40_v23 = vadd.f32 %v240_v7, %v39_v16 }
  0x13   :  { %v42_v24 = vsel %vm41_vm1, %v240_v7, %v40_v23 }
  0x78   :  { %v32_v25 = vpop.xlane.xlu0 %31 }
  0x79   :  { %v43_v26 = vmul.f32 %v42_v24, %v32_v25 }
  0x7b   :  { %v45_v27 = vadd.f32 1e-06, %v43_v26 }
  0x7d   :  { %241 = vrsqrt.f32 %v45_v27  ;;  %vm53_vm3 = vweird.f32 %v45_v27 }
  0x80   :  { %v35_v28 = vpop.xlane.xlu0 %34 }
  0x81   :  { %v44_v29 = vmul.f32 %v42_v24, %v35_v28 }
  0x83   :  { %v242_v30 = vpop.eup %241  ;;  %v46_v31 = vadd.f32 1e-06, %v44_v29 }
  0x84   :  { %v48_v32 = vmul.f32 %v242_v30, %v45_v27  ;;  %vm54_vm2 = vweird.f32 %v242_v30 }
  0x85   :  { %243 = vrsqrt.f32 %v46_v31  ;;  %vm55_vm4 = vmor %vm53_vm3, %vm54_vm2  ;;  %vm63_vm6 = vweird.f32 %v46_v31 }
  0x86   :  { %v49_v33 = vmul.f32 %v242_v30, %v48_v32 }
  0x88   :  { %v50_v34 = vmul.f32 0.5, %v49_v33 }
  0x8a   :  { %v51_v35 = vsub.f32 1.5, %v50_v34 }
  0x8b   :  { %v244_v36 = vpop.eup %243 }
  0x8c   :  { %v52_v37 = vmul.f32 %v242_v30, %v51_v35  ;;  %v58_v38 = vmul.f32 %v244_v36, %v46_v31  ;;  %vm64_vm5 = vweird.f32 %v244_v36 }
  0x8d   :  { %vm65_vm7 = vmor %vm63_vm6, %vm64_vm5 }
  0x8e   :  { %v59_v40 = vmul.f32 %v244_v36, %v58_v38  ;;  %v56_v41 = vsel %vm55_vm4, %v242_v30, %v52_v37 }
  0x8f   :  { %v67_v42 = vmul.f32 %v56_v41, %v370_v0 }
  0x90   :  { %v60_v43 = vmul.f32 0.5, %v59_v40 }
  0x91   :  { %v73_v44 = vmul.f32 %v238_v39, %v67_v42 }
  0x92   :  { %v61_v45 = vsub.f32 1.5, %v60_v43 }
  0x93   :  { %222 = vmatmul.msk.f32.vlgmr.msra.gmra.mxu0 %vm29_vm0, %v73_v44  ;;  %224 = vmatmul.msk.f32.vlgmr.msra.gmra.mxu1 %vm29_vm0, %v73_v44 }
  0x94   :  { %v62_v46 = vmul.f32 %v244_v36, %v61_v45  ;;  %226 = vmatmul.msk.f32.vlgmr.msra.gmra.mxu2 %vm29_vm0, %v73_v44 }
  0x96   :  { %v66_v47 = vsel %vm65_vm7, %v244_v36, %v62_v46 }
  0x97   :  { %v68_v48 = vmul.f32 %v66_v47, %v377_v2 }
  0x99   :  { %v74_v49 = vmul.f32 %v238_v39, %v68_v48 }
  0x9b   :  { %223 = vmatmul.msk.f32.vlgmr.msra.gmra.mxu3 %vm29_vm0, %v74_v49  ;;  %225 = vmatmul.msk.f32.gmra.mxu1 %vm29_vm0, %v74_v49 }
  0x9c   :  { %227 = vmatmul.msk.f32.gmra.mxu2 %vm29_vm0, %v74_v49 }
 0x110   :  { %v102_v50 = vpop.f32.mrf.mxu0  ;;  %v131_v51 = vpop.f32.mrf.mxu1 }
 0x111   :  { %108 = vst.msk [vmem:[#allocation2] sm:$0xff] %vm29_vm0, %v102_v50 }
 0x112   :  { %138 = vst.msk [vmem:[#allocation4] sm:$0xff] %vm137_vm8, %v131_v51 }
 0x117   :  { %v161_v52 = vpop.f32.mrf.mxu2 }
 0x118   :  { %167 = vst.msk [vmem:[#allocation6] sm:$0xff] %vm137_vm8, %v161_v52  ;;  %v134_v53 = vpop.f32.mrf.mxu1 }
 0x119   :  { %139 = vst.msk [vmem:[#allocation4 + $0x8] sm:$0xff] %vm137_vm8, %v134_v53 }
 0x11a   :  { %194 = dma.vmem_to_hbm [thread:$0]  %s187_s4, 256, %s189_s0, [#allocation5], %s324_s12, %s324_s12, %s325_s13  }
 0x11e   :  { %v105_v54 = vpop.f32.mrf.mxu3 }
 0x11f   :  { %109 = vst.msk [vmem:[#allocation2 + $0x8] sm:$0xff] %vm29_vm0, %v105_v54  ;;  %v164_v55 = vpop.f32.mrf.mxu2 }
 0x120   :  { %168 = vst.msk [vmem:[#allocation6 + $0x8] sm:$0xff] %vm137_vm8, %v164_v55  ;;  %181 = dma.vmem_to_hbm [thread:$0]  %s174_s8, 256, %s176_s11, [#allocation3], %s324_s12, %s324_s12, %s325_s13  }
 0x121   :  { %207 = dma.vmem_to_hbm [thread:$0]  %s200_s15, 256, %s202_s17, [#allocation5], %s324_s12, %s324_s12, %s325_s13  }
 0x122   :  { %317 = dma.done.wait [#allocation3], 256  }
 0x123   :  { %318 = vsyncadd [#allocation3], 4294967040 }
 0x124   :  { %319 = dma.done.wait [#allocation5], 512  }
 0x125   :  { %320 = vsyncadd [#allocation5], 4294966784 }
 0x126   :  { %220 = vsyncpa [#allocation3], 1 }
 0x127   :  { %221 = vsyncpa [#allocation5], 1 }

</bundles_post_ra>
